<compile_context>
chip_gen: v7x
topology: tpu7x:2x2x1
jax: 0.10.0
libtpu: 0.0.40
codegen_flags: <defaults>
</compile_context>

<pallas_src>
import functools

import jax
import jax.numpy as jnp
from jax.experimental import pallas as pl
from jax.experimental.pallas import tpu as pltpu

EPS = 1e-5


def _round_up(x, m):
    return (x + m - 1) // m * m


def _vmem_capacity_bytes():
    """Per-TensorCore VMEM capacity; conservative fallback if query fails."""
    try:
        cap = int(pltpu.get_tpu_info().vmem_capacity_bytes)
        if cap > 0:
            return cap
    except Exception:
        pass
    return 64 << 20  # v7x per-core VMEM (safe lower bound for v5e/v6e too)


def _layernorm_f32(x_f32, gamma_f32, beta_f32, inv_d):
    # Padded feature lanes of x are zero, so the sums over the padded width
    # are exact; no lane mask needed (var = E[x^2] - mean^2).
    mean = jnp.sum(x_f32, axis=-1, keepdims=True) * inv_d
    msq = jnp.sum(x_f32 * x_f32, axis=-1, keepdims=True) * inv_d
    var = msq - mean * mean
    x_norm = (x_f32 - mean) * jax.lax.rsqrt(var + EPS)
    return x_norm * gamma_f32 + beta_f32


def _kernel_resident_w(x_ref, gamma_ref, beta_ref, w_ref, b_ref, o_ref, *, inv_d):
    """1-D grid over row tiles; full W^T resident in VMEM (fetched once)."""
    x = x_ref[...].astype(jnp.float32)
    y = _layernorm_f32(x,
                       gamma_ref[...].astype(jnp.float32),
                       beta_ref[...].astype(jnp.float32),
                       inv_d)
    out = jnp.dot(y.astype(w_ref.dtype), w_ref[...],
                  preferred_element_type=jnp.float32)
    o_ref[...] = (out + b_ref[...].astype(jnp.float32)).astype(o_ref.dtype)


def _kernel_col_tiled(x_ref, gamma_ref, beta_ref, w_ref, b_ref, o_ref, y_ref, *,
                      inv_d):
    """2-D grid (rows, cols); LN computed once per row tile via a y scratch."""
    @pl.when(pl.program_id(1) == 0)
    def _():
        x = x_ref[...].astype(jnp.float32)
        y = _layernorm_f32(x,
                           gamma_ref[...].astype(jnp.float32),
                           beta_ref[...].astype(jnp.float32),
                           inv_d)
        y_ref[...] = y.astype(y_ref.dtype)

    out = jnp.dot(y_ref[...], w_ref[...], preferred_element_type=jnp.float32)
    o_ref[...] = (out + b_ref[...].astype(jnp.float32)).astype(o_ref.dtype)


def pre_layer_norm(x, gamma, beta, w, b, *, tile_rows=256, tile_cols=256,
                   fast_bf16_matmul=False, _force_column_tiling=False):
    """y = Linear(LayerNorm(x)).

    x: (..., D).  gamma, beta, b: (D,).  w: (D, D) PyTorch-style Linear weight.
    """
    orig_shape = x.shape
    D = orig_shape[-1]
    M = 1
    for s in orig_shape[:-1]:
        M *= s
    x2d = x.reshape(M, D)

    # fn == nn.Linear(dim, dim): y @ W^T + b.  Opt-in bf16 MXU fast path for
    # f32 weights (f32 accumulation preserved).
    w_mat = w
    if fast_bf16_matmul and w_mat.dtype == jnp.float32:
        w_mat = w_mat.astype(jnp.bfloat16)
    w_t = jnp.transpose(w_mat)  # (D_in, D_out): kernel computes y @ w_t

    x_bytes = x.dtype.itemsize
    w_bytes = w_t.dtype.itemsize
    out_bytes = x.dtype.itemsize

    # Lane-dense feature dim; no-op for the typical 128-multiple model dims.
    # Rows are NOT padded: the grid uses a partial last block instead.
    D_pad = _round_up(D, 128)

    def pad_cols(a):
        if a.shape[-1] == D_pad:
            return a
        return jnp.pad(a, [(0, 0)] * (a.ndim - 1) + [(0, D_pad - a.shape[-1])])

    x_p = pad_cols(x2d)
    gamma_p = pad_cols(gamma.reshape(1, D))
    beta_p = pad_cols(beta.reshape(1, D))
    b_p = pad_cols(b.reshape(1, D))
    w_p = w_t
    if w_p.shape != (D_pad, D_pad):
        w_p = jnp.pad(w_p, ((0, D_pad - D), (0, D_pad - D)))

    cap = _vmem_capacity_bytes()
    budget = int(cap * 0.45)

    def ln_tmp(tm_):
        return 3 * tm_ * D_pad * 4          # f32 LN intermediates / y cast

    const_bytes = 3 * D_pad * 4 * 2         # gamma / beta / bias blocks

    tm_max = min(_round_up(tile_rows, 8), _round_up(M, 8))
    tm_min = min(tm_max, 128) if M >= 128 else tm_max

    def est_resident(tm_):
        return (2 * tm_ * D_pad * x_bytes       # x row tiles (double buffered)
                + 2 * D_pad * D_pad * w_bytes   # resident W^T
                + 2 * tm_ * D_pad * out_bytes   # output tiles
                + ln_tmp(tm_) + const_bytes)

    def est_col(tm_, tn_):
        return (2 * tm_ * D_pad * x_bytes
                + 2 * D_pad * tn_ * w_bytes     # W^T column tiles
                + 2 * tm_ * tn_ * out_bytes
                + tm_ * D_pad * w_bytes         # post-LN y scratch
                + ln_tmp(tm_) + const_bytes)

    # TODO(synk): pipeline_mode=pl.Buffered(1) on constant-index blocks
    # (gamma/beta/bias, and resident W) would halve their VMEM footprint.

    # --- pick configuration -------------------------------------------------
    use_resident = not _force_column_tiling
    tm = tm_max
    if use_resident:
        while est_resident(tm) > budget and tm > tm_min:
            tm = max(tm_min, _round_up(tm // 2, 8))
        use_resident = est_resident(tm) <= budget

    inv_d = 1.0 / float(D)

    if use_resident:
        grid = (pl.cdiv(M, tm),)
        vmem_need = est_resident(tm)
        kernel = functools.partial(_kernel_resident_w, inv_d=inv_d)
        in_specs = [
            pl.BlockSpec((tm, D_pad), lambda i: (i, 0)),       # x rows
            pl.BlockSpec((1, D_pad), lambda i: (0, 0)),        # gamma
            pl.BlockSpec((1, D_pad), lambda i: (0, 0)),        # beta
            pl.BlockSpec((D_pad, D_pad), lambda i: (0, 0)),    # W^T (fetched once)
            pl.BlockSpec((1, D_pad), lambda i: (0, 0)),        # bias
        ]
        out_specs = pl.BlockSpec((tm, D_pad), lambda i: (i, 0))
        scratch_shapes = []
        dim_sem = ("parallel",)
        w_reads = 1
    else:
        tm = tm_max
        tn = 256 if (D_pad % 256 == 0 and tile_cols >= 256) else 128
        tn = min(tn, D_pad)
        while est_col(tm, tn) > budget and tn > 128:
            tn //= 2
        while est_col(tm, tn) > budget and tm > tm_min:
            tm = max(tm_min, _round_up(tm // 2, 8))
        # TODO(synk): tile the contraction (K) axis with an f32 accumulator when
        # even (tm=128, tn=128) full-width blocks exceed the VMEM budget.
        grid = (pl.cdiv(M, tm), D_pad // tn)
        vmem_need = est_col(tm, tn)
        kernel = functools.partial(_kernel_col_tiled, inv_d=inv_d)
        in_specs = [
            pl.BlockSpec((tm, D_pad), lambda i, j: (i, 0)),    # x rows (DMAed once per row tile)
            pl.BlockSpec((1, D_pad), lambda i, j: (0, 0)),     # gamma
            pl.BlockSpec((1, D_pad), lambda i, j: (0, 0)),     # beta
            pl.BlockSpec((D_pad, tn), lambda i, j: (0, j)),    # W^T column tile
            pl.BlockSpec((1, tn), lambda i, j: (0, j)),        # bias column tile
        ]
        out_specs = pl.BlockSpec((tm, tn), lambda i, j: (i, j))
        scratch_shapes = [pltpu.VMEM((tm, D_pad), w_p.dtype)]  # post-LN y cache
        dim_sem = ("parallel", "arbitrary")
        w_reads = grid[0]

    vmem_limit = max(int(vmem_need * 1.25), 16 << 20)
    vmem_limit = min(vmem_limit, int(cap * 0.75))

    flops = 2 * M * D_pad * D_pad + 9 * M * D_pad
    bytes_accessed = (M * D_pad * x_bytes
                      + w_reads * D_pad * D_pad * w_bytes
                      + M * D_pad * out_bytes
                      + 3 * D_pad * 4)

    out_p = pl.pallas_call(
        kernel,
        out_shape=jax.ShapeDtypeStruct((M, D_pad), x.dtype),
        grid=grid,
        in_specs=in_specs,
        out_specs=out_specs,
        scratch_shapes=scratch_shapes,
        compiler_params=pltpu.CompilerParams(
            dimension_semantics=dim_sem,
            vmem_limit_bytes=int(vmem_limit),
        ),
        cost_estimate=pl.CostEstimate(
            flops=int(flops), transcendentals=int(M),
            bytes_accessed=int(bytes_accessed)),
    )(x_p, gamma_p, beta_p, w_p, b_p)

    out = out_p if D == D_pad else out_p[:, :D]
    return out.reshape(orig_shape)


def reference(x, gamma, beta, w, b):
    xf = x.astype(jnp.float32)
    mean = jnp.mean(xf, axis=-1, keepdims=True)
    var = jnp.mean((xf - mean) ** 2, axis=-1, keepdims=True)
    xn = (xf - mean) / jnp.sqrt(var + EPS)
    y = xn * gamma.astype(jnp.float32) + beta.astype(jnp.float32)
    return y @ w.astype(jnp.float32).T + b.astype(jnp.float32)


def _make_inputs(shape, dtype, key):
    D = shape[-1]
    kx, kw, kb = jax.random.split(key, 3)
    x = jax.random.normal(kx, shape, dtype=jnp.float32).astype(dtype)
    # nn.LayerNorm(dim) defaults: weight=1, bias=0
    gamma = jnp.ones((D,), dtype)
    beta = jnp.zeros((D,), dtype)
    # fn = nn.Linear(dim, dim), deterministic synthetic init
    bound = 1.0 / (D ** 0.5)
    w = jax.random.uniform(kw, (D, D), minval=-bound, maxval=bound,
                           dtype=jnp.float32).astype(dtype)
    b = jax.random.uniform(kb, (D,), minval=-bound, maxval=bound,
                           dtype=jnp.float32).astype(dtype)
    return x, gamma, beta, w, b


if __name__ == "__main__":
    key = jax.random.PRNGKey(0)
    k1, k2, k3 = jax.random.split(key, 3)

    # 1) f32, small unaligned feature dim (padded-lane path, resident W).
    x, gamma, beta, w, b = _make_inputs((2, 8, 32), jnp.float32, k1)
    out = pre_layer_norm(x, gamma, beta, w, b)
    jax.block_until_ready(out)
    ref = reference(x, gamma, beta, w, b)
    assert out.shape == (2, 8, 32)
    assert jnp.allclose(out.astype(jnp.float32), ref, atol=1e-3, rtol=1e-3)

    # 2) bf16 end-to-end (native bf16 MXU matmul, f32 LN stats + accumulation).
    xb, gb, bb, wb, bbias = (a.astype(jnp.bfloat16) for a in (x, gamma, beta, w, b))
    out_bf16 = pre_layer_norm(xb, gb, bb, wb, bbias)
    jax.block_until_ready(out_bf16)
    ref_bf16 = reference(xb, gb, bb, wb, bbias)
    assert out_bf16.dtype == jnp.bfloat16
    assert jnp.allclose(out_bf16.astype(jnp.float32), ref_bf16, atol=1e-1, rtol=1e-1)

    # 3) f32 inputs, lane-aligned D, opt-in bf16 MXU fast path.
    x3, g3, be3, w3, b3 = _make_inputs((3, 8, 128), jnp.float32, k2)
    out3 = pre_layer_norm(x3, g3, be3, w3, b3, fast_bf16_matmul=True)
    jax.block_until_ready(out3)
    ref3 = reference(x3, g3, be3, w3, b3)
    assert jnp.allclose(out3, ref3, atol=2e-2, rtol=2e-2)

    # 4) Column-tiled fallback path (y-scratch + pl.when(j == 0) LN reuse).
    x4, g4, be4, w4, b4 = _make_inputs((2, 8, 256), jnp.float32, k3)
    out4 = pre_layer_norm(x4, g4, be4, w4, b4, tile_cols=128,
                          _force_column_tiling=True)
    jax.block_until_ready(out4)
    ref4 = reference(x4, g4, be4, w4, b4)
    assert jnp.allclose(out4, ref4, atol=1e-3, rtol=1e-3)

    print("KERNEL_OK")
</pallas_src>

<mosaic_0001>
module attributes {stable_mosaic.version = 11 : i64} {
  func.func @_kernel_resident_w(%arg0: i32, %arg1: memref<16x128xf32, #tpu.memory_space<vmem>>, %arg2: memref<1x128xf32, #tpu.memory_space<vmem>>, %arg3: memref<1x128xf32, #tpu.memory_space<vmem>>, %arg4: memref<128x128xf32, #tpu.memory_space<vmem>>, %arg5: memref<1x128xf32, #tpu.memory_space<vmem>>, %arg6: memref<16x128xf32, #tpu.memory_space<vmem>>) attributes {dimension_semantics = [#tpu.dimension_semantics<parallel>], iteration_bounds = array<i64: 1>, scalar_prefetch = 0 : i64, scratch_operands = 0 : i64, tpu.core_type = #tpu.core_type<tc>, window_params = [{transform_indices = @transform_0, window_bounds = array<i64: 16, 128>}, {pipeline_mode = #tpu.pipeline_mode<synchronous>, transform_indices = @transform_1, window_bounds = array<i64: 1, 128>}, {pipeline_mode = #tpu.pipeline_mode<synchronous>, transform_indices = @transform_2, window_bounds = array<i64: 1, 128>}, {pipeline_mode = #tpu.pipeline_mode<synchronous>, transform_indices = @transform_3, window_bounds = array<i64: 128, 128>}, {pipeline_mode = #tpu.pipeline_mode<synchronous>, transform_indices = @transform_4, window_bounds = array<i64: 1, 128>}, {transform_indices = @transform_5, window_bounds = array<i64: 16, 128>}]} {
    %c0 = arith.constant 0 : index
    %c0_0 = arith.constant 0 : index
    %0 = vector.load %arg1[%c0, %c0_0] : memref<16x128xf32, #tpu.memory_space<vmem>>, vector<16x128xf32>
    %c0_1 = arith.constant 0 : index
    %c0_2 = arith.constant 0 : index
    %1 = vector.load %arg2[%c0_1, %c0_2] : memref<1x128xf32, #tpu.memory_space<vmem>>, vector<1x128xf32>
    %c0_3 = arith.constant 0 : index
    %c0_4 = arith.constant 0 : index
    %2 = vector.load %arg3[%c0_3, %c0_4] : memref<1x128xf32, #tpu.memory_space<vmem>>, vector<1x128xf32>
    %cst = arith.constant dense<0.000000e+00> : vector<16xf32>
    %3 = vector.multi_reduction <add>, %0, %cst [1] : vector<16x128xf32> to vector<16xf32>
    %4 = vector.shape_cast %3 : vector<16xf32> to vector<16x1xf32>
    %cst_5 = arith.constant 3.125000e-02 : f32
    %5 = vector.broadcast %cst_5 : f32 to vector<16x1xf32>
    %6 = arith.mulf %4, %5 : vector<16x1xf32>
    %7 = arith.mulf %0, %0 : vector<16x128xf32>
    %cst_6 = arith.constant dense<0.000000e+00> : vector<16xf32>
    %8 = vector.multi_reduction <add>, %7, %cst_6 [1] : vector<16x128xf32> to vector<16xf32>
    %9 = vector.shape_cast %8 : vector<16xf32> to vector<16x1xf32>
    %cst_7 = arith.constant 3.125000e-02 : f32
    %10 = vector.broadcast %cst_7 : f32 to vector<16x1xf32>
    %11 = arith.mulf %9, %10 : vector<16x1xf32>
    %12 = arith.mulf %6, %6 : vector<16x1xf32>
    %13 = arith.subf %11, %12 : vector<16x1xf32>
    %14 = vector.broadcast %6 : vector<16x1xf32> to vector<16x128xf32>
    %15 = arith.subf %0, %14 : vector<16x128xf32>
    %cst_8 = arith.constant 9.99999974E-6 : f32
    %16 = vector.broadcast %cst_8 : f32 to vector<16x1xf32>
    %17 = arith.addf %13, %16 : vector<16x1xf32>
    %18 = math.rsqrt %17 : vector<16x1xf32>
    %19 = vector.broadcast %18 : vector<16x1xf32> to vector<16x128xf32>
    %20 = arith.mulf %15, %19 : vector<16x128xf32>
    %21 = vector.broadcast %1 : vector<1x128xf32> to vector<16x128xf32>
    %22 = arith.mulf %20, %21 : vector<16x128xf32>
    %23 = vector.broadcast %2 : vector<1x128xf32> to vector<16x128xf32>
    %24 = arith.addf %22, %23 : vector<16x128xf32>
    %c0_9 = arith.constant 0 : index
    %c0_10 = arith.constant 0 : index
    %25 = vector.load %arg4[%c0_9, %c0_10] : memref<128x128xf32, #tpu.memory_space<vmem>>, vector<128x128xf32>
    %cst_11 = arith.constant dense<0.000000e+00> : vector<16x128xf32>
    %26 = tpu.matmul %24, %25, %cst_11 {dimension_numbers = #tpu.dot_dimension_numbers<[1], [0], [0], [1], [0, 0, 1, 1], [], []>} : vector<16x128xf32>, vector<128x128xf32>, vector<16x128xf32> -> vector<16x128xf32>
    %c0_12 = arith.constant 0 : index
    %c0_13 = arith.constant 0 : index
    %27 = vector.load %arg5[%c0_12, %c0_13] : memref<1x128xf32, #tpu.memory_space<vmem>>, vector<1x128xf32>
    %28 = vector.broadcast %27 : vector<1x128xf32> to vector<16x128xf32>
    %29 = arith.addf %26, %28 : vector<16x128xf32>
    %c0_14 = arith.constant 0 : index
    %c0_15 = arith.constant 0 : index
    %30 = vector.load %arg6[%c0_14, %c0_15] : memref<16x128xf32, #tpu.memory_space<vmem>>, vector<16x128xf32>
    tpu.vector_store %arg6[%c0_14, %c0_15], %29 {strides = array<i32>} : memref<16x128xf32, #tpu.memory_space<vmem>>, vector<16x128xf32>,
    return
  }
  func.func @transform_0(%arg0: i32) -> (i32, i32) {
    %c0_i32 = arith.constant 0 : i32
    %c0_i32_0 = arith.constant 0 : i32
    return %arg0, %c0_i32 : i32, i32
  }
  func.func @transform_1(%arg0: i32) -> (i32, i32) {
    %c0_i32 = arith.constant 0 : i32
    %c0_i32_0 = arith.constant 0 : i32
    %c0_i32_1 = arith.constant 0 : i32
    return %c0_i32, %c0_i32_0 : i32, i32
  }
  func.func @transform_2(%arg0: i32) -> (i32, i32) {
    %c0_i32 = arith.constant 0 : i32
    %c0_i32_0 = arith.constant 0 : i32
    %c0_i32_1 = arith.constant 0 : i32
    return %c0_i32, %c0_i32_0 : i32, i32
  }
  func.func @transform_3(%arg0: i32) -> (i32, i32) {
    %c0_i32 = arith.constant 0 : i32
    %c0_i32_0 = arith.constant 0 : i32
    %c0_i32_1 = arith.constant 0 : i32
    return %c0_i32, %c0_i32_0 : i32, i32
  }
  func.func @transform_4(%arg0: i32) -> (i32, i32) {
    %c0_i32 = arith.constant 0 : i32
    %c0_i32_0 = arith.constant 0 : i32
    %c0_i32_1 = arith.constant 0 : i32
    return %c0_i32, %c0_i32_0 : i32, i32
  }
  func.func @transform_5(%arg0: i32) -> (i32, i32) {
    %c0_i32 = arith.constant 0 : i32
    %c0_i32_0 = arith.constant 0 : i32
    return %arg0, %c0_i32 : i32, i32
  }
}

</mosaic_0001>

<bundles_post_ra>
// kernel: tpu_custom_call.1
= control target key start
LH: loop header
LB: loop body
LE: loop exit
PB: predicated region body
PF: predicated region fallthrough
CT: control target
= control target key end

     0   :  { %10 = vsyncpa [#allocation3], 0  ;;  %s483_s0 = inlined_call_operand.hbm [shape: f32[16,128], index: 0, kind: input, shape index: {}]   ;;  %s484_s1 = inlined_call_operand.vmem [shape: f32[1,128], index: 1, kind: input, shape index: {}]   ;;  %s485_s2 = inlined_call_operand.vmem [shape: f32[1,128], index: 2, kind: input, shape index: {}]   ;;  %s486_s3 = inlined_call_operand.hbm [shape: f32[128,128], index: 3, kind: input, shape index: {}]   ;;  %s487_s4 = inlined_call_operand.vmem [shape: f32[1,128], index: 4, kind: input, shape index: {}]   ;;  %s488_s5 = inlined_call_operand.hbm [shape: f32[16,128], index: 5, kind: output, shape index: {}]  }
   0x1   :  { %11 = vsyncpa [#allocation6], 0 }
   0x2   :  { %12 = vsyncpa [#allocation4], 0  ;;  %s382_s18 = smov [#allocation2]   ;;  %s310_s22 = scalar_lea.hbm %s483_s0, 256 }
   0x3   :  { %s18_s19 = sshll.u32 %s382_s18, 4  ;;  %p311_p0 = scmp.ne.s32.totalorder %s483_s0, %s310_s22  ;;  %s19_s19 = int_to_ptr.vmem [resolvable:$true] %s18_s19 }
   0x4   :  { %p314_p1 = scmp.lt.u32.totalorder %s310_s22, %s483_s0 }
   0x6   :  { %p316_p2 = pnand %p314_p1, %p311_p0 }
   0x8   :  { %319 = shalt.err (!%p316_p2)
}
   0x9   :  { %s320_s27 = scalar_lea.vmem %s19_s19, 256  ;;  %p325_p4 = scmp.lt.s32.totalorder %s19_s19, %s19_s19 }
   0xa   :  { %p321_p3 = scmp.ne.s32.totalorder %s19_s19, %s320_s27  ;;  %p326_p5 = scmp.lt.s32.totalorder %s320_s27, %s320_s27 }
   0xc   :  { %p327_p6 = por %p326_p5, %p325_p4 }
   0xe   :  { %p328_p7 = pnand %p327_p6, %p321_p3 }
  0x10   :  { %331 = shalt.err (!%p328_p7)
}
  0x11   :  { %s383_s28 = smov 128   ;;  %s384_s29 = smov 8  }
  0x12   :  { %24 = dma.hbm_to_vmem [thread:$0]  %s483_s0, 256, %s19_s19, [#allocation3], %s383_s28, %s383_s28, %s384_s29  }
  0x13   :  { %s385_s7 = smov [#allocation5]   ;;  %s332_s11 = scalar_lea.hbm %s486_s3, 2048 }
  0x14   :  { %s34_s8 = sshll.u32 %s385_s7, 4  ;;  %p333_p8 = scmp.ne.s32.totalorder %s486_s3, %s332_s11  ;;  %s35_s8 = int_to_ptr.vmem [resolvable:$true] %s34_s8 }
  0x15   :  { %p336_p9 = scmp.lt.u32.totalorder %s332_s11, %s486_s3 }
  0x17   :  { %p338_p10 = pnand %p336_p9, %p333_p8 }
  0x19   :  { %341 = shalt.err (!%p338_p10)
}
  0x1a   :  { %s342_s16 = scalar_lea.vmem %s35_s8, 2048  ;;  %p347_p12 = scmp.lt.s32.totalorder %s35_s8, %s35_s8 }
  0x1b   :  { %p343_p11 = scmp.ne.s32.totalorder %s35_s8, %s342_s16  ;;  %p348_p13 = scmp.lt.s32.totalorder %s342_s16, %s342_s16 }
  0x1d   :  { %p349_p0 = por %p348_p13, %p347_p12 }
  0x1f   :  { %p350_p1 = pnand %p349_p0, %p343_p11 }
  0x21   :  { %353 = shalt.err (!%p350_p1)
}
  0x22   :  { %40 = dma.hbm_to_vmem [thread:$0]  %s486_s3, 2048, %s35_s8, [#allocation6], %s383_s28, %s383_s28, %s384_s29  }
  0x23   :  { %376 = dma.done.wait [#allocation3], 256  }
  0x24   :  { %377 = vsyncadd [#allocation3], 4294967040 }
  0x25   :  { %378 = dma.done.wait [#allocation6], 2048  }
  0x26   :  { %379 = vsyncadd [#allocation6], 4294965248  ;;  %v447_v0 = vld [vmem:[#allocation2] sm:$0xff]  ;;  %v449_v1 = vld [vmem:[#allocation2 + $0x8] sm:$0xff] }
  0x27   :  { %v95_v2 = vld [vmem:[#allocation5] sm:$0xff]  ;;  %53 = vadd.xlane.f32.xlu0 %v447_v0  ;;  %v59_v3 = vmul.f32 %v447_v0, %v447_v0  ;;  %v96_v4 = vld [vmem:[#allocation5 + $0x8] sm:$0xff]  ;;  %v60_v6 = vmul.f32 %v449_v1, %v449_v1  ;;  %v97_v7 = vld [vmem:[#allocation5 + $0x10] sm:$0xff] }
  0x28   :  { %v269_v5 = vpack.c.bf16 %v96_v4, %v95_v2  ;;  %v98_v8 = vld [vmem:[#allocation5 + $0x18] sm:$0xff]  ;;  %v99_v10 = vld [vmem:[#allocation5 + $0x20] sm:$0xff]  ;;  %v100_v11 = vld [vmem:[#allocation5 + $0x28] sm:$0xff] }
  0x29   :  { %61 = vadd.xlane.f32.xlu1 %v59_v3  ;;  %v273_v9 = vpack.c.bf16 %v98_v8, %v97_v7  ;;  %v277_v12 = vpack.c.bf16 %v100_v11, %v99_v10  ;;  %v101_v13 = vld [vmem:[#allocation5 + $0x30] sm:$0xff]  ;;  %v102_v14 = vld [vmem:[#allocation5 + $0x38] sm:$0xff]  ;;  %v103_v16 = vld [vmem:[#allocation5 + $0x40] sm:$0xff] }
  0x2a   :  { %270 = vmatprep.subr.bf16.mxu0 %v269_v5  ;;  %v281_v15 = vpack.c.bf16 %v102_v14, %v101_v13  ;;  %v104_v17 = vld [vmem:[#allocation5 + $0x48] sm:$0xff]  ;;  %v105_v19 = vld [vmem:[#allocation5 + $0x50] sm:$0xff]  ;;  %v106_v20 = vld [vmem:[#allocation5 + $0x58] sm:$0xff] }
  0x2b   :  { %55 = vadd.xlane.f32.xlu0 %v449_v1  ;;  %272 = vmatpush3.bf16.msra.mxu0 %v269_v5  ;;  %v285_v18 = vpack.c.bf16 %v104_v17, %v103_v16  ;;  %v107_v21 = vld [vmem:[#allocation5 + $0x60] sm:$0xff]  ;;  %v289_v22 = vpack.c.bf16 %v106_v20, %v105_v19  ;;  %v108_v23 = vld [vmem:[#allocation5 + $0x68] sm:$0xff]  ;;  %v109_v25 = vld [vmem:[#allocation5 + $0x70] sm:$0xff] }
  0x2c   :  { %274 = vmatprep.subr.bf16.mxu0 %v273_v9  ;;  %v293_v24 = vpack.c.bf16 %v108_v23, %v107_v21  ;;  %v110_v26 = vld [vmem:[#allocation5 + $0x78] sm:$0xff]  ;;  %v213_v44 = vld [vmem:[%s484_s1] ss:$0 sm:$0xff]  ;;  %s386_s1 = smov [#allocation7]  }
  0x2d   :  { %63 = vadd.xlane.f32.xlu1 %v60_v6  ;;  %v297_v27 = vpack.c.bf16 %v110_v26, %v109_v25  ;;  %v214_v46 = vld [vmem:[%s485_s2] ss:$0 sm:$0xff]  ;;  %s200_s23 = sshll.u32 %s386_s1, 4  ;;  %s201_s23 = int_to_ptr.vmem [resolvable:$true] %s200_s23 }
  0x2e   :  { %v215_v54 = vld [vmem:[%s487_s4] ss:$0 sm:$0xff]  ;;  %s354_s2 = scalar_lea.vmem %s201_s23, 256  ;;  %p359_p3 = scmp.lt.s32.totalorder %s201_s23, %s201_s23 }
  0x2f   :  { %276 = vmatpush3.bf16.msra.mxu0 %v273_v9  ;;  %p355_p2 = scmp.ne.s32.totalorder %s201_s23, %s354_s2  ;;  %p360_p4 = scmp.lt.s32.totalorder %s354_s2, %s354_s2 }
  0x30   :  { %278 = vmatprep.subr.bf16.mxu0 %v277_v12 }
  0x31   :  { %p361_p5 = por %p360_p4, %p359_p3 }
  0x33   :  { %280 = vmatpush3.bf16.msra.mxu0 %v277_v12  ;;  %p362_p6 = pnand %p361_p5, %p355_p2 }
  0x34   :  { %282 = vmatprep.subr.bf16.mxu0 %v281_v15 }
  0x37   :  { %284 = vmatpush3.bf16.msra.mxu0 %v281_v15 }
  0x38   :  { %286 = vmatprep.subr.bf16.mxu0 %v285_v18 }
  0x3b   :  { %288 = vmatpush3.bf16.msra.mxu0 %v285_v18 }
  0x3c   :  { %290 = vmatprep.subr.bf16.mxu0 %v289_v22 }
  0x3f   :  { %292 = vmatpush3.bf16.msra.mxu0 %v289_v22 }
  0x40   :  { %294 = vmatprep.subr.bf16.mxu0 %v293_v24 }
  0x43   :  { %296 = vmatpush3.bf16.msra.mxu0 %v293_v24 }
  0x44   :  { %298 = vmatprep.subr.bf16.mxu0 %v297_v27 }
  0x47   :  { %300 = vmatpush3.bf16.msra.mxu0 %v297_v27 }
  0xb4   :  { %v54_v28 = vpop.xlane.xlu0 %53 }
  0xb5   :  { %v57_v29 = vmul.f32 0.03125, %v54_v28 }
  0xb6   :  { %v62_v30 = vpop.xlane.xlu1 %61 }
  0xb7   :  { %v67_v31 = vmul.f32 %v57_v29, %v57_v29  ;;  %v65_v32 = vmul.f32 0.03125, %v62_v30  ;;  %v71_v42 = vsub.f32 %v447_v0, %v57_v29 }
  0xb8   :  { %v56_v33 = vpop.xlane.xlu0 %55 }
  0xb9   :  { %v69_v34 = vsub.f32 %v65_v32, %v67_v31  ;;  %v58_v35 = vmul.f32 0.03125, %v56_v33 }
  0xba   :  { %v64_v36 = vpop.xlane.xlu1 %63 }
  0xbb   :  { %v73_v37 = vadd.f32 1e-05, %v69_v34  ;;  %v68_v38 = vmul.f32 %v58_v35, %v58_v35  ;;  %v66_v39 = vmul.f32 0.03125, %v64_v36  ;;  %v72_v47 = vsub.f32 %v449_v1, %v58_v35 }
  0xbd   :  { %306 = vrsqrt.f32 %v73_v37  ;;  %v70_v40 = vsub.f32 %v66_v39, %v68_v38 }
  0xbf   :  { %v74_v41 = vadd.f32 1e-05, %v70_v40 }
  0xc1   :  { %308 = vrsqrt.f32 %v74_v41 }
  0xc7   :  { %v307_v43 = vpop.eup %306 }
  0xc8   :  { %v77_v45 = vmul.f32 %v307_v43, %v71_v42 }
  0xca   :  { %v85_v48 = vmul.f32 %v213_v44, %v77_v45 }
  0xcb   :  { %v309_v49 = vpop.eup %308 }
  0xcc   :  { %v78_v50 = vmul.f32 %v309_v49, %v72_v47  ;;  %v93_v51 = vadd.f32 %v214_v46, %v85_v48 }
  0xce   :  { %v86_v52 = vmul.f32 %v213_v44, %v78_v50  ;;  %266 = vmatprep.mubr.f32.mxu0 %v93_v51 }
  0xd0   :  { %v94_v53 = vadd.f32 %v214_v46, %v86_v52 }
  0xd2   :  { %267 = vmatmul.mubr.f32.vlgmr.msra.gmra.mrb[0].mxu0 %v94_v53 }
 0x1a5   :  { %v268_v55 = vpop.f32.mrb[0].mxu0 }
 0x1a6   :  { %v190_v56 = vadd.f32 %v268_v55, %v215_v54  ;;  %v184_v57 = vpop.f32.mrb[1].mxu0 }
 0x1a7   :  { %v185_v58 = vadd.f32 %v215_v54, %v184_v57 }
 0x1a8   :  { %194 = vst [vmem:[#allocation7 + $0x8] sm:$0xff] %v190_v56 }
 0x1a9   :  { %193 = vst [vmem:[#allocation7] sm:$0xff] %v185_v58 }
 0x1aa   :  { %365 = shalt.err (!%p362_p6)
}
 0x1ab   :  { %s366_s4 = scalar_lea.hbm %s488_s5, 256 }
 0x1ac   :  { %p367_p7 = scmp.ne.s32.totalorder %s488_s5, %s366_s4  ;;  %p370_p8 = scmp.lt.u32.totalorder %s366_s4, %s488_s5 }
 0x1ae   :  { %p372_p9 = pnand %p370_p8, %p367_p7 }
 0x1b0   :  { %375 = shalt.err (!%p372_p9)
}
 0x1b1   :  { %206 = dma.vmem_to_hbm [thread:$0]  %s201_s23, 256, %s488_s5, [#allocation4], %s383_s28, %s383_s28, %s384_s29  }
 0x1b2   :  { %380 = dma.done.wait [#allocation4], 256  }
 0x1b3   :  { %381 = vsyncadd [#allocation4], 4294967040 }
 0x1b4   :  { %210 = vsyncpa [#allocation3], 1 }
 0x1b5   :  { %211 = vsyncpa [#allocation6], 1 }
 0x1b6   :  { %212 = vsyncpa [#allocation4], 1 }

</bundles_post_ra>
